<compile_context>
chip_gen: v5e
topology: v5e:2x2
jax: 0.10.0
libtpu: 0.0.40
codegen_flags: <defaults>
</compile_context>

<pallas_src>
import jax
import jax.numpy as jnp
from jax.experimental import pallas as pl
from jax.experimental.pallas import tpu as pltpu


# ---------------------------------------------------------------------------
# Kernel: one batch element per grid step, everything fused.
# ---------------------------------------------------------------------------
def _hff_kernel(x_ref, rh_ref, kw_ref, m1x_ref, m1r_ref, m2_ref,
                bmask_ref, bin_ref, bout_ref, o_ref,
                xpad, rpad, ypad):
    """x_ref:    (1, H, W*Cin)     flattened lane-dense input image
       rh_ref:   (H, H)            fused bilinear down/up matrix along H
       kw_ref:   (W*Cin, W*Cin)    kron(Rw^T, I_Cin) down/up matrix along W
       m1x_ref:  (3, W*Cin, 2*W*Cmid)  [mask_conv | in_conv] Toeplitz weights
       m1r_ref:  (3, W*Cin, W*Cmid)    residual_conv Toeplitz weights
       m2_ref:   (3, W*Cmid, W*Cin)    out_conv Toeplitz weights
       b*_ref:   per-pixel tiled biases
       o_ref:    (1, H, W*Cin)
       xpad/rpad/ypad: (H+2, ...) zero-H-border VMEM scratch."""
    H = x_ref.shape[1]
    WC_in = x_ref.shape[2]
    WC_mid = bmask_ref.shape[1]

    xf = x_ref[0]                                        # (H, W*Cin), f32-ish
    xf = xf.astype(jnp.float32)

    # ---- high-frequency residual:  r = x - up(down(x))  (2 small matmuls) ----
    ud = jnp.dot(rh_ref[...], xf, preferred_element_type=jnp.float32)
    ud = jnp.dot(ud, kw_ref[...], preferred_element_type=jnp.float32)
    rf = xf - ud

    # ---- zero-H-border padded copies in VMEM (W halo is inside the weights) --
    zrow_in = jnp.zeros((1, WC_in), jnp.float32)
    xpad[0:1, :] = zrow_in
    xpad[H + 1:H + 2, :] = zrow_in
    xpad[1:H + 1, :] = xf
    rpad[0:1, :] = zrow_in
    rpad[H + 1:H + 2, :] = zrow_in
    rpad[1:H + 1, :] = rf

    # ---- stage 1: mask_conv(x)+residual_conv(r)  and  in_conv(x), fused ------
    acc1 = jnp.zeros((H, 2 * WC_mid), jnp.float32)       # [pre_mask | in_feat]
    accr = jnp.zeros((H, WC_mid), jnp.float32)
    for dh in range(3):                                  # static unroll (3 taps)
        acc1 = acc1 + jnp.dot(xpad[dh:dh + H, :], m1x_ref[dh],
                              preferred_element_type=jnp.float32)
        accr = accr + jnp.dot(rpad[dh:dh + H, :], m1r_ref[dh],
                              preferred_element_type=jnp.float32)
    pre_mask = acc1[:, :WC_mid] + accr + bmask_ref[...]
    in_feat = acc1[:, WC_mid:] + bin_ref[...]
    gated = in_feat * jax.nn.sigmoid(pre_mask)           # (H, W*Cmid)

    # ---- stage 2: out_conv on the gated features (still in VMEM) -------------
    zrow_mid = jnp.zeros((1, WC_mid), jnp.float32)
    ypad[0:1, :] = zrow_mid
    ypad[H + 1:H + 2, :] = zrow_mid
    ypad[1:H + 1, :] = gated

    acc2 = jnp.zeros((H, o_ref.shape[2]), jnp.float32)
    for dh in range(3):
        acc2 = acc2 + jnp.dot(ypad[dh:dh + H, :], m2_ref[dh],
                              preferred_element_type=jnp.float32)
    o_ref[...] = (acc2 + bout_ref[...])[None].astype(o_ref.dtype)


# ---------------------------------------------------------------------------
# Wrapper-side weight preprocessing
# ---------------------------------------------------------------------------
def _resize_matrix(out_size, in_size):
    """PyTorch F.interpolate(mode='bilinear', align_corners=False) along one
    axis, as a dense (out_size, in_size) matrix."""
    i = jnp.arange(out_size, dtype=jnp.float32)
    src = jnp.maximum((i + 0.5) * (in_size / out_size) - 0.5, 0.0)
    j0f = jnp.floor(src)
    lam = src - j0f
    j0 = j0f.astype(jnp.int32)
    j1 = jnp.minimum(j0 + 1, in_size - 1)
    rows = jnp.arange(out_size)
    m = jnp.zeros((out_size, in_size), jnp.float32)
    m = m.at[rows, j0].add(1.0 - lam)
    m = m.at[rows, j1].add(lam)
    return m


def _toeplitz(w_oihw, Wsp):
    """PyTorch conv weight (Cout, Cin, 3, 3), stride 1, pad 1  ->
    (3, Wsp*Cin, Wsp*Cout): one banded block-Toeplitz matrix per kernel row dh
    such that   out[h] = sum_dh  x_hpad[dh + h] @ M[dh]
    with rows flattened pixel-major (w fast over channels):  col = w*C + c.
    The W-direction zero padding is encoded by the band structure."""
    w_taps = jnp.transpose(w_oihw, (2, 3, 1, 0)).astype(jnp.float32)  # (dh,dw,Ci,Co)
    w_out = jnp.arange(Wsp)
    Cout, Cin = w_oihw.shape[0], w_oihw.shape[1]
    mats = []
    for dh in range(3):
        M = jnp.zeros((Wsp * Cin, Wsp * Cout), jnp.float32)
        for dw in range(3):
            w_in = w_out + dw - 1
            valid = ((w_in >= 0) & (w_in < Wsp)).astype(jnp.float32)
            sel = jnp.zeros((Wsp, Wsp), jnp.float32)
            sel = sel.at[jnp.clip(w_in, 0, Wsp - 1), w_out].add(valid)
            M = M + jnp.kron(sel, w_taps[dh, dw])
        mats.append(M)
    return jnp.stack(mats, axis=0)


def _full_spec(arr):
    nd = arr.ndim
    return pl.BlockSpec(arr.shape, lambda n, _nd=nd: (0,) * _nd)


# ---------------------------------------------------------------------------
# Public wrapper (NCHW in / NCHW out, like the PyTorch module)
# ---------------------------------------------------------------------------
def high_frequency_focus(x_nchw, params):
    N, Cin, H, W = x_nchw.shape
    Cmid = params['in_conv_w'].shape[0]
    WC_in, WC_mid = W * Cin, W * Cmid

    # NCHW -> lane-dense (N, H, W*Cin) slabs (channels fastest).
    xf = jnp.transpose(x_nchw, (0, 2, 3, 1)).reshape(N, H, WC_in)

    # Fused bilinear down(size//2)/up(size) resize matrices (align_corners=False).
    Rh = _resize_matrix(H, H // 2) @ _resize_matrix(H // 2, H)         # (H, H)
    Rw = _resize_matrix(W, W // 2) @ _resize_matrix(W // 2, W)         # (W, W)
    Kw = jnp.kron(Rw.T, jnp.eye(Cin, dtype=jnp.float32))               # (W*Cin, W*Cin)

    # Toeplitz-expanded conv weights; mask_conv and in_conv share the LHS so
    # their matrices are column-concatenated into one matmul.
    Tm = _toeplitz(params['mask_conv_w'], W)          # (3, W*Cin,  W*Cmid)
    Ti = _toeplitz(params['in_conv_w'], W)            # (3, W*Cin,  W*Cmid)
    Tr = _toeplitz(params['residual_conv_w'], W)      # (3, W*Cin,  W*Cmid)
    To = _toeplitz(params['out_conv_w'], W)           # (3, W*Cmid, W*Cin)
    M1x = jnp.concatenate([Tm, Ti], axis=-1)          # (3, W*Cin, 2*W*Cmid)

    b_mask = jnp.tile(params['mask_conv_b'] + params['residual_conv_b'], W)[None, :]
    b_in = jnp.tile(params['in_conv_b'], W)[None, :]
    b_out = jnp.tile(params['out_conv_b'], W)[None, :]

    out = pl.pallas_call(
        _hff_kernel,
        out_shape=jax.ShapeDtypeStruct((N, H, WC_in), x_nchw.dtype),
        grid=(N,),
        in_specs=[
            pl.BlockSpec((1, H, WC_in), lambda n: (n, 0, 0)),
            _full_spec(Rh), _full_spec(Kw),
            _full_spec(M1x), _full_spec(Tr), _full_spec(To),
            _full_spec(b_mask), _full_spec(b_in), _full_spec(b_out),
        ],
        out_specs=pl.BlockSpec((1, H, WC_in), lambda n: (n, 0, 0)),
        scratch_shapes=[
            pltpu.VMEM((H + 2, WC_in), jnp.float32),   # x, zero H-border
            pltpu.VMEM((H + 2, WC_in), jnp.float32),   # residual, zero H-border
            pltpu.VMEM((H + 2, WC_mid), jnp.float32),  # gated, zero H-border
        ],
        compiler_params=pltpu.CompilerParams(dimension_semantics=("parallel",)),
    )(xf, Rh, Kw, M1x, Tr, To, b_mask, b_in, b_out)

    return jnp.transpose(out.reshape(N, H, W, Cin), (0, 3, 1, 2))      # -> NCHW


# ---------------------------------------------------------------------------
# Pure-JAX reference (independent path: lax.conv + einsum resize)
# ---------------------------------------------------------------------------
def reference(x_nchw, params):
    x = jnp.transpose(x_nchw, (0, 2, 3, 1))
    N, H, W, Cin = x.shape
    Rh = _resize_matrix(H, H // 2) @ _resize_matrix(H // 2, H)
    Rw = _resize_matrix(W, W // 2) @ _resize_matrix(W // 2, W)
    ud = jnp.einsum('hH,nHWc->nhWc', Rh, x)
    ud = jnp.einsum('wW,nhWc->nhwc', Rw, ud)
    residual = x - ud

    def conv(inp, w, b):
        whwio = jnp.transpose(w, (2, 3, 1, 0))
        o = jax.lax.conv_general_dilated(
            inp, whwio, (1, 1), 'SAME',
            dimension_numbers=('NHWC', 'HWIO', 'NHWC'))
        return o + b[None, None, None, :]

    mask = jax.nn.sigmoid(
        conv(x, params['mask_conv_w'], params['mask_conv_b'])
        + conv(residual, params['residual_conv_w'], params['residual_conv_b']))
    y = conv(x, params['in_conv_w'], params['in_conv_b']) * mask
    o = conv(y, params['out_conv_w'], params['out_conv_b'])
    return jnp.transpose(o, (0, 3, 1, 2))


if __name__ == "__main__":
    N, Cin, Cmid, H, W = 2, 4, 8, 16, 16
    key = jax.random.PRNGKey(0)
    ks = jax.random.split(key, 8)
    params = {
        'mask_conv_w':     0.1 * jax.random.normal(ks[0], (Cmid, Cin, 3, 3), jnp.float32),
        'mask_conv_b':     0.1 * jax.random.normal(ks[1], (Cmid,), jnp.float32),
        'residual_conv_w': 0.1 * jax.random.normal(ks[2], (Cmid, Cin, 3, 3), jnp.float32),
        'residual_conv_b': 0.1 * jax.random.normal(ks[3], (Cmid,), jnp.float32),
        'in_conv_w':       0.1 * jax.random.normal(ks[4], (Cmid, Cin, 3, 3), jnp.float32),
        'in_conv_b':       0.1 * jax.random.normal(ks[5], (Cmid,), jnp.float32),
        # matches nn.init.normal_(out_conv.weight, 0, 1e-4) and zero bias
        'out_conv_w':      1e-4 * jax.random.normal(ks[6], (Cin, Cmid, 3, 3), jnp.float32),
        'out_conv_b':      jnp.zeros((Cin,), jnp.float32),
    }
    x = jax.random.normal(ks[7], (N, Cin, H, W), jnp.float32)

    hff = jax.jit(high_frequency_focus)
    out = jax.block_until_ready(hff(x, params))
    ref = jax.block_until_ready(reference(x, params))
    assert out.shape == (N, Cin, H, W), out.shape
    # out_conv weights are 1e-4-scaled so outputs are ~3e-3; both paths use the
    # default TPU matmul precision, so allow a small absolute slack while still
    # being ~2 orders of magnitude below any structural (tap-mapping) error.
    max_err = float(jnp.max(jnp.abs(out - ref)))
    assert jnp.allclose(out, ref, atol=5e-5, rtol=1e-2), f"max_err={max_err}"
    print("KERNEL_OK")
</pallas_src>

<mosaic_0001>
module attributes {stable_mosaic.version = 11 : i64} {
  func.func @_hff_kernel(%arg0: i32, %arg1: memref<1x16x64xf32, #tpu.memory_space<vmem>>, %arg2: memref<16x16xf32, #tpu.memory_space<vmem>>, %arg3: memref<64x64xf32, #tpu.memory_space<vmem>>, %arg4: memref<3x64x256xf32, #tpu.memory_space<vmem>>, %arg5: memref<3x64x128xf32, #tpu.memory_space<vmem>>, %arg6: memref<3x128x64xf32, #tpu.memory_space<vmem>>, %arg7: memref<1x128xf32, #tpu.memory_space<vmem>>, %arg8: memref<1x128xf32, #tpu.memory_space<vmem>>, %arg9: memref<1x64xf32, #tpu.memory_space<vmem>>, %arg10: memref<1x16x64xf32, #tpu.memory_space<vmem>>, %arg11: memref<18x64xf32, #tpu.memory_space<vmem>>, %arg12: memref<18x64xf32, #tpu.memory_space<vmem>>, %arg13: memref<18x128xf32, #tpu.memory_space<vmem>>) attributes {dimension_semantics = [#tpu.dimension_semantics<parallel>], iteration_bounds = array<i64: 2>, scalar_prefetch = 0 : i64, scratch_operands = 3 : i64, tpu.core_type = #tpu.core_type<tc>, window_params = [{transform_indices = @transform_0, window_bounds = array<i64: 1, 16, 64>}, {pipeline_mode = #tpu.pipeline_mode<synchronous>, transform_indices = @transform_1, window_bounds = array<i64: 16, 16>}, {pipeline_mode = #tpu.pipeline_mode<synchronous>, transform_indices = @transform_2, window_bounds = array<i64: 64, 64>}, {pipeline_mode = #tpu.pipeline_mode<synchronous>, transform_indices = @transform_3, window_bounds = array<i64: 3, 64, 256>}, {pipeline_mode = #tpu.pipeline_mode<synchronous>, transform_indices = @transform_4, window_bounds = array<i64: 3, 64, 128>}, {pipeline_mode = #tpu.pipeline_mode<synchronous>, transform_indices = @transform_5, window_bounds = array<i64: 3, 128, 64>}, {pipeline_mode = #tpu.pipeline_mode<synchronous>, transform_indices = @transform_6, window_bounds = array<i64: 1, 128>}, {pipeline_mode = #tpu.pipeline_mode<synchronous>, transform_indices = @transform_7, window_bounds = array<i64: 1, 128>}, {pipeline_mode = #tpu.pipeline_mode<synchronous>, transform_indices = @transform_8, window_bounds = array<i64: 1, 64>}, {transform_indices = @transform_9, window_bounds = array<i64: 1, 16, 64>}]} {
    %c0 = arith.constant 0 : index
    %c0_0 = arith.constant 0 : index
    %c0_1 = arith.constant 0 : index
    %0 = vector.load %arg1[%c0, %c0_0, %c0_1] : memref<1x16x64xf32, #tpu.memory_space<vmem>>, vector<1x16x64xf32>
    %1 = vector.shape_cast %0 : vector<1x16x64xf32> to vector<16x64xf32>
    %c0_2 = arith.constant 0 : index
    %c0_3 = arith.constant 0 : index
    %2 = vector.load %arg2[%c0_2, %c0_3] : memref<16x16xf32, #tpu.memory_space<vmem>>, vector<16x16xf32>
    %cst = arith.constant dense<0.000000e+00> : vector<16x64xf32>
    %3 = tpu.matmul %2, %1, %cst {dimension_numbers = #tpu.dot_dimension_numbers<[1], [0], [0], [1], [0, 0, 1, 1], [], []>} : vector<16x16xf32>, vector<16x64xf32>, vector<16x64xf32> -> vector<16x64xf32>
    %c0_4 = arith.constant 0 : index
    %c0_5 = arith.constant 0 : index
    %4 = vector.load %arg3[%c0_4, %c0_5] : memref<64x64xf32, #tpu.memory_space<vmem>>, vector<64x64xf32>
    %cst_6 = arith.constant dense<0.000000e+00> : vector<16x64xf32>
    %5 = tpu.matmul %3, %4, %cst_6 {dimension_numbers = #tpu.dot_dimension_numbers<[1], [0], [0], [1], [0, 0, 1, 1], [], []>} : vector<16x64xf32>, vector<64x64xf32>, vector<16x64xf32> -> vector<16x64xf32>
    %6 = arith.subf %1, %5 : vector<16x64xf32>
    %cst_7 = arith.constant 0.000000e+00 : f32
    %7 = vector.broadcast %cst_7 : f32 to vector<1x64xf32>
    %c0_8 = arith.constant 0 : index
    %c0_9 = arith.constant 0 : index
    %8 = vector.load %arg11[%c0_8, %c0_9] : memref<18x64xf32, #tpu.memory_space<vmem>>, vector<1x64xf32>
    tpu.vector_store %arg11[%c0_8, %c0_9], %7 {strides = array<i32>} : memref<18x64xf32, #tpu.memory_space<vmem>>, vector<1x64xf32>,
    %c17 = arith.constant 17 : index
    %c0_10 = arith.constant 0 : index
    %9 = vector.load %arg11[%c17, %c0_10] : memref<18x64xf32, #tpu.memory_space<vmem>>, vector<1x64xf32>
    tpu.vector_store %arg11[%c17, %c0_10], %7 {strides = array<i32>} : memref<18x64xf32, #tpu.memory_space<vmem>>, vector<1x64xf32>,
    %c1 = arith.constant 1 : index
    %c0_11 = arith.constant 0 : index
    %10 = vector.load %arg11[%c1, %c0_11] : memref<18x64xf32, #tpu.memory_space<vmem>>, vector<16x64xf32>
    tpu.vector_store %arg11[%c1, %c0_11], %1 {strides = array<i32>} : memref<18x64xf32, #tpu.memory_space<vmem>>, vector<16x64xf32>,
    %c0_12 = arith.constant 0 : index
    %c0_13 = arith.constant 0 : index
    %11 = vector.load %arg12[%c0_12, %c0_13] : memref<18x64xf32, #tpu.memory_space<vmem>>, vector<1x64xf32>
    tpu.vector_store %arg12[%c0_12, %c0_13], %7 {strides = array<i32>} : memref<18x64xf32, #tpu.memory_space<vmem>>, vector<1x64xf32>,
    %c17_14 = arith.constant 17 : index
    %c0_15 = arith.constant 0 : index
    %12 = vector.load %arg12[%c17_14, %c0_15] : memref<18x64xf32, #tpu.memory_space<vmem>>, vector<1x64xf32>
    tpu.vector_store %arg12[%c17_14, %c0_15], %7 {strides = array<i32>} : memref<18x64xf32, #tpu.memory_space<vmem>>, vector<1x64xf32>,
    %c1_16 = arith.constant 1 : index
    %c0_17 = arith.constant 0 : index
    %13 = vector.load %arg12[%c1_16, %c0_17] : memref<18x64xf32, #tpu.memory_space<vmem>>, vector<16x64xf32>
    tpu.vector_store %arg12[%c1_16, %c0_17], %6 {strides = array<i32>} : memref<18x64xf32, #tpu.memory_space<vmem>>, vector<16x64xf32>,
    %cst_18 = arith.constant 0.000000e+00 : f32
    %14 = vector.broadcast %cst_18 : f32 to vector<16x256xf32>
    %cst_19 = arith.constant 0.000000e+00 : f32
    %15 = vector.broadcast %cst_19 : f32 to vector<16x128xf32>
    %c0_20 = arith.constant 0 : index
    %c0_21 = arith.constant 0 : index
    %16 = vector.load %arg11[%c0_20, %c0_21] : memref<18x64xf32, #tpu.memory_space<vmem>>, vector<16x64xf32>
    %c0_22 = arith.constant 0 : index
    %c0_23 = arith.constant 0 : index
    %c0_24 = arith.constant 0 : index
    %17 = vector.load %arg4[%c0_22, %c0_23, %c0_24] : memref<3x64x256xf32, #tpu.memory_space<vmem>>, vector<1x64x256xf32>
    %18 = vector.shape_cast %17 : vector<1x64x256xf32> to vector<64x256xf32>
    %cst_25 = arith.constant dense<0.000000e+00> : vector<16x256xf32>
    %19 = tpu.matmul %16, %18, %cst_25 {dimension_numbers = #tpu.dot_dimension_numbers<[1], [0], [0], [1], [0, 0, 1, 1], [], []>} : vector<16x64xf32>, vector<64x256xf32>, vector<16x256xf32> -> vector<16x256xf32>
    %20 = arith.addf %14, %19 : vector<16x256xf32>
    %c0_26 = arith.constant 0 : index
    %c0_27 = arith.constant 0 : index
    %21 = vector.load %arg12[%c0_26, %c0_27] : memref<18x64xf32, #tpu.memory_space<vmem>>, vector<16x64xf32>
    %c0_28 = arith.constant 0 : index
    %c0_29 = arith.constant 0 : index
    %c0_30 = arith.constant 0 : index
    %22 = vector.load %arg5[%c0_28, %c0_29, %c0_30] : memref<3x64x128xf32, #tpu.memory_space<vmem>>, vector<1x64x128xf32>
    %23 = vector.shape_cast %22 : vector<1x64x128xf32> to vector<64x128xf32>
    %cst_31 = arith.constant dense<0.000000e+00> : vector<16x128xf32>
    %24 = tpu.matmul %21, %23, %cst_31 {dimension_numbers = #tpu.dot_dimension_numbers<[1], [0], [0], [1], [0, 0, 1, 1], [], []>} : vector<16x64xf32>, vector<64x128xf32>, vector<16x128xf32> -> vector<16x128xf32>
    %25 = arith.addf %15, %24 : vector<16x128xf32>
    %c1_32 = arith.constant 1 : index
    %c0_33 = arith.constant 0 : index
    %26 = vector.load %arg11[%c1_32, %c0_33] : memref<18x64xf32, #tpu.memory_space<vmem>>, vector<16x64xf32>
    %c1_34 = arith.constant 1 : index
    %c0_35 = arith.constant 0 : index
    %c0_36 = arith.constant 0 : index
    %27 = vector.load %arg4[%c1_34, %c0_35, %c0_36] : memref<3x64x256xf32, #tpu.memory_space<vmem>>, vector<1x64x256xf32>
    %28 = vector.shape_cast %27 : vector<1x64x256xf32> to vector<64x256xf32>
    %cst_37 = arith.constant dense<0.000000e+00> : vector<16x256xf32>
    %29 = tpu.matmul %26, %28, %cst_37 {dimension_numbers = #tpu.dot_dimension_numbers<[1], [0], [0], [1], [0, 0, 1, 1], [], []>} : vector<16x64xf32>, vector<64x256xf32>, vector<16x256xf32> -> vector<16x256xf32>
    %30 = arith.addf %20, %29 : vector<16x256xf32>
    %c1_38 = arith.constant 1 : index
    %c0_39 = arith.constant 0 : index
    %31 = vector.load %arg12[%c1_38, %c0_39] : memref<18x64xf32, #tpu.memory_space<vmem>>, vector<16x64xf32>
    %c1_40 = arith.constant 1 : index
    %c0_41 = arith.constant 0 : index
    %c0_42 = arith.constant 0 : index
    %32 = vector.load %arg5[%c1_40, %c0_41, %c0_42] : memref<3x64x128xf32, #tpu.memory_space<vmem>>, vector<1x64x128xf32>
    %33 = vector.shape_cast %32 : vector<1x64x128xf32> to vector<64x128xf32>
    %cst_43 = arith.constant dense<0.000000e+00> : vector<16x128xf32>
    %34 = tpu.matmul %31, %33, %cst_43 {dimension_numbers = #tpu.dot_dimension_numbers<[1], [0], [0], [1], [0, 0, 1, 1], [], []>} : vector<16x64xf32>, vector<64x128xf32>, vector<16x128xf32> -> vector<16x128xf32>
    %35 = arith.addf %25, %34 : vector<16x128xf32>
    %c2 = arith.constant 2 : index
    %c0_44 = arith.constant 0 : index
    %36 = vector.load %arg11[%c2, %c0_44] : memref<18x64xf32, #tpu.memory_space<vmem>>, vector<16x64xf32>
    %c2_45 = arith.constant 2 : index
    %c0_46 = arith.constant 0 : index
    %c0_47 = arith.constant 0 : index
    %37 = vector.load %arg4[%c2_45, %c0_46, %c0_47] : memref<3x64x256xf32, #tpu.memory_space<vmem>>, vector<1x64x256xf32>
    %38 = vector.shape_cast %37 : vector<1x64x256xf32> to vector<64x256xf32>
    %cst_48 = arith.constant dense<0.000000e+00> : vector<16x256xf32>
    %39 = tpu.matmul %36, %38, %cst_48 {dimension_numbers = #tpu.dot_dimension_numbers<[1], [0], [0], [1], [0, 0, 1, 1], [], []>} : vector<16x64xf32>, vector<64x256xf32>, vector<16x256xf32> -> vector<16x256xf32>
    %40 = arith.addf %30, %39 : vector<16x256xf32>
    %c2_49 = arith.constant 2 : index
    %c0_50 = arith.constant 0 : index
    %41 = vector.load %arg12[%c2_49, %c0_50] : memref<18x64xf32, #tpu.memory_space<vmem>>, vector<16x64xf32>
    %c2_51 = arith.constant 2 : index
    %c0_52 = arith.constant 0 : index
    %c0_53 = arith.constant 0 : index
    %42 = vector.load %arg5[%c2_51, %c0_52, %c0_53] : memref<3x64x128xf32, #tpu.memory_space<vmem>>, vector<1x64x128xf32>
    %43 = vector.shape_cast %42 : vector<1x64x128xf32> to vector<64x128xf32>
    %cst_54 = arith.constant dense<0.000000e+00> : vector<16x128xf32>
    %44 = tpu.matmul %41, %43, %cst_54 {dimension_numbers = #tpu.dot_dimension_numbers<[1], [0], [0], [1], [0, 0, 1, 1], [], []>} : vector<16x64xf32>, vector<64x128xf32>, vector<16x128xf32> -> vector<16x128xf32>
    %45 = arith.addf %35, %44 : vector<16x128xf32>
    %46 = vector.extract_strided_slice %40 {offsets = [0, 0], sizes = [16, 128], strides = [1, 1]} : vector<16x256xf32> to vector<16x128xf32>
    %47 = arith.addf %46, %45 : vector<16x128xf32>
    %c0_55 = arith.constant 0 : index
    %c0_56 = arith.constant 0 : index
    %48 = vector.load %arg7[%c0_55, %c0_56] : memref<1x128xf32, #tpu.memory_space<vmem>>, vector<1x128xf32>
    %49 = vector.broadcast %48 : vector<1x128xf32> to vector<16x128xf32>
    %50 = arith.addf %47, %49 : vector<16x128xf32>
    %51 = vector.extract_strided_slice %40 {offsets = [0, 128], sizes = [16, 128], strides = [1, 1]} : vector<16x256xf32> to vector<16x128xf32>
    %c0_57 = arith.constant 0 : index
    %c0_58 = arith.constant 0 : index
    %52 = vector.load %arg8[%c0_57, %c0_58] : memref<1x128xf32, #tpu.memory_space<vmem>>, vector<1x128xf32>
    %53 = vector.broadcast %52 : vector<1x128xf32> to vector<16x128xf32>
    %54 = arith.addf %51, %53 : vector<16x128xf32>
    %55 = arith.negf %50 : vector<16x128xf32>
    %56 = math.exp %55 : vector<16x128xf32>
    %cst_59 = arith.constant 1.000000e+00 : f32
    %57 = vector.broadcast %cst_59 : f32 to vector<16x128xf32>
    %58 = arith.addf %57, %56 : vector<16x128xf32>
    %59 = arith.divf %57, %58 : vector<16x128xf32>
    %60 = arith.mulf %54, %59 : vector<16x128xf32>
    %cst_60 = arith.constant 0.000000e+00 : f32
    %61 = vector.broadcast %cst_60 : f32 to vector<1x128xf32>
    %c0_61 = arith.constant 0 : index
    %c0_62 = arith.constant 0 : index
    %62 = vector.load %arg13[%c0_61, %c0_62] : memref<18x128xf32, #tpu.memory_space<vmem>>, vector<1x128xf32>
    tpu.vector_store %arg13[%c0_61, %c0_62], %61 {strides = array<i32>} : memref<18x128xf32, #tpu.memory_space<vmem>>, vector<1x128xf32>,
    %c17_63 = arith.constant 17 : index
    %c0_64 = arith.constant 0 : index
    %63 = vector.load %arg13[%c17_63, %c0_64] : memref<18x128xf32, #tpu.memory_space<vmem>>, vector<1x128xf32>
    tpu.vector_store %arg13[%c17_63, %c0_64], %61 {strides = array<i32>} : memref<18x128xf32, #tpu.memory_space<vmem>>, vector<1x128xf32>,
    %c1_65 = arith.constant 1 : index
    %c0_66 = arith.constant 0 : index
    %64 = vector.load %arg13[%c1_65, %c0_66] : memref<18x128xf32, #tpu.memory_space<vmem>>, vector<16x128xf32>
    tpu.vector_store %arg13[%c1_65, %c0_66], %60 {strides = array<i32>} : memref<18x128xf32, #tpu.memory_space<vmem>>, vector<16x128xf32>,
    %cst_67 = arith.constant 0.000000e+00 : f32
    %65 = vector.broadcast %cst_67 : f32 to vector<16x64xf32>
    %c0_68 = arith.constant 0 : index
    %c0_69 = arith.constant 0 : index
    %66 = vector.load %arg13[%c0_68, %c0_69] : memref<18x128xf32, #tpu.memory_space<vmem>>, vector<16x128xf32>
    %c0_70 = arith.constant 0 : index
    %c0_71 = arith.constant 0 : index
    %c0_72 = arith.constant 0 : index
    %67 = vector.load %arg6[%c0_70, %c0_71, %c0_72] : memref<3x128x64xf32, #tpu.memory_space<vmem>>, vector<1x128x64xf32>
    %68 = vector.shape_cast %67 : vector<1x128x64xf32> to vector<128x64xf32>
    %cst_73 = arith.constant dense<0.000000e+00> : vector<16x64xf32>
    %69 = tpu.matmul %66, %68, %cst_73 {dimension_numbers = #tpu.dot_dimension_numbers<[1], [0], [0], [1], [0, 0, 1, 1], [], []>} : vector<16x128xf32>, vector<128x64xf32>, vector<16x64xf32> -> vector<16x64xf32>
    %70 = arith.addf %65, %69 : vector<16x64xf32>
    %c1_74 = arith.constant 1 : index
    %c0_75 = arith.constant 0 : index
    %71 = vector.load %arg13[%c1_74, %c0_75] : memref<18x128xf32, #tpu.memory_space<vmem>>, vector<16x128xf32>
    %c1_76 = arith.constant 1 : index
    %c0_77 = arith.constant 0 : index
    %c0_78 = arith.constant 0 : index
    %72 = vector.load %arg6[%c1_76, %c0_77, %c0_78] : memref<3x128x64xf32, #tpu.memory_space<vmem>>, vector<1x128x64xf32>
    %73 = vector.shape_cast %72 : vector<1x128x64xf32> to vector<128x64xf32>
    %cst_79 = arith.constant dense<0.000000e+00> : vector<16x64xf32>
    %74 = tpu.matmul %71, %73, %cst_79 {dimension_numbers = #tpu.dot_dimension_numbers<[1], [0], [0], [1], [0, 0, 1, 1], [], []>} : vector<16x128xf32>, vector<128x64xf32>, vector<16x64xf32> -> vector<16x64xf32>
    %75 = arith.addf %70, %74 : vector<16x64xf32>
    %c2_80 = arith.constant 2 : index
    %c0_81 = arith.constant 0 : index
    %76 = vector.load %arg13[%c2_80, %c0_81] : memref<18x128xf32, #tpu.memory_space<vmem>>, vector<16x128xf32>
    %c2_82 = arith.constant 2 : index
    %c0_83 = arith.constant 0 : index
    %c0_84 = arith.constant 0 : index
    %77 = vector.load %arg6[%c2_82, %c0_83, %c0_84] : memref<3x128x64xf32, #tpu.memory_space<vmem>>, vector<1x128x64xf32>
    %78 = vector.shape_cast %77 : vector<1x128x64xf32> to vector<128x64xf32>
    %cst_85 = arith.constant dense<0.000000e+00> : vector<16x64xf32>
    %79 = tpu.matmul %76, %78, %cst_85 {dimension_numbers = #tpu.dot_dimension_numbers<[1], [0], [0], [1], [0, 0, 1, 1], [], []>} : vector<16x128xf32>, vector<128x64xf32>, vector<16x64xf32> -> vector<16x64xf32>
    %80 = arith.addf %75, %79 : vector<16x64xf32>
    %c0_86 = arith.constant 0 : index
    %c0_87 = arith.constant 0 : index
    %81 = vector.load %arg9[%c0_86, %c0_87] : memref<1x64xf32, #tpu.memory_space<vmem>>, vector<1x64xf32>
    %82 = vector.broadcast %81 : vector<1x64xf32> to vector<16x64xf32>
    %83 = arith.addf %80, %82 : vector<16x64xf32>
    %84 = vector.shape_cast %83 : vector<16x64xf32> to vector<1x16x64xf32>
    %c0_88 = arith.constant 0 : index
    %c0_89 = arith.constant 0 : index
    %c0_90 = arith.constant 0 : index
    %85 = vector.load %arg10[%c0_88, %c0_89, %c0_90] : memref<1x16x64xf32, #tpu.memory_space<vmem>>, vector<1x16x64xf32>
    tpu.vector_store %arg10[%c0_88, %c0_89, %c0_90], %84 {strides = array<i32>} : memref<1x16x64xf32, #tpu.memory_space<vmem>>, vector<1x16x64xf32>,
    return
  }
  func.func @transform_0(%arg0: i32) -> (i32, i32, i32) {
    %c0_i32 = arith.constant 0 : i32
    %c0_i32_0 = arith.constant 0 : i32
    %c0_i32_1 = arith.constant 0 : i32
    return %arg0, %c0_i32, %c0_i32_0 : i32, i32, i32
  }
  func.func @transform_1(%arg0: i32) -> (i32, i32) {
    %c0_i32 = arith.constant 0 : i32
    %c0_i32_0 = arith.constant 0 : i32
    %c0_i32_1 = arith.constant 0 : i32
    return %c0_i32, %c0_i32_0 : i32, i32
  }
  func.func @transform_2(%arg0: i32) -> (i32, i32) {
    %c0_i32 = arith.constant 0 : i32
    %c0_i32_0 = arith.constant 0 : i32
    %c0_i32_1 = arith.constant 0 : i32
    return %c0_i32, %c0_i32_0 : i32, i32
  }
  func.func @transform_3(%arg0: i32) -> (i32, i32, i32) {
    %c0_i32 = arith.constant 0 : i32
    %c0_i32_0 = arith.constant 0 : i32
    %c0_i32_1 = arith.constant 0 : i32
    %c0_i32_2 = arith.constant 0 : i32
    return %c0_i32, %c0_i32_0, %c0_i32_1 : i32, i32, i32
  }
  func.func @transform_4(%arg0: i32) -> (i32, i32, i32) {
    %c0_i32 = arith.constant 0 : i32
    %c0_i32_0 = arith.constant 0 : i32
    %c0_i32_1 = arith.constant 0 : i32
    %c0_i32_2 = arith.constant 0 : i32
    return %c0_i32, %c0_i32_0, %c0_i32_1 : i32, i32, i32
  }
  func.func @transform_5(%arg0: i32) -> (i32, i32, i32) {
    %c0_i32 = arith.constant 0 : i32
    %c0_i32_0 = arith.constant 0 : i32
    %c0_i32_1 = arith.constant 0 : i32
    %c0_i32_2 = arith.constant 0 : i32
    return %c0_i32, %c0_i32_0, %c0_i32_1 : i32, i32, i32
  }
  func.func @transform_6(%arg0: i32) -> (i32, i32) {
    %c0_i32 = arith.constant 0 : i32
    %c0_i32_0 = arith.constant 0 : i32
    %c0_i32_1 = arith.constant 0 : i32
    return %c0_i32, %c0_i32_0 : i32, i32
  }
  func.func @transform_7(%arg0: i32) -> (i32, i32) {
    %c0_i32 = arith.constant 0 : i32
    %c0_i32_0 = arith.constant 0 : i32
    %c0_i32_1 = arith.constant 0 : i32
    return %c0_i32, %c0_i32_0 : i32, i32
  }
  func.func @transform_8(%arg0: i32) -> (i32, i32) {
    %c0_i32 = arith.constant 0 : i32
    %c0_i32_0 = arith.constant 0 : i32
    %c0_i32_1 = arith.constant 0 : i32
    return %c0_i32, %c0_i32_0 : i32, i32
  }
  func.func @transform_9(%arg0: i32) -> (i32, i32, i32) {
    %c0_i32 = arith.constant 0 : i32
    %c0_i32_0 = arith.constant 0 : i32
    %c0_i32_1 = arith.constant 0 : i32
    return %arg0, %c0_i32, %c0_i32_0 : i32, i32, i32
  }
}

</mosaic_0001>

<bundles_post_ra>
// kernel: tile.18
= control target key start
LH: loop header
LB: loop body
LE: loop exit
PB: predicated region body
PF: predicated region fallthrough
CT: control target
= control target key end

     0   :  { %s28_s0 = inlined_call_operand.vmem [shape: f32[8], index: 0, kind: input, shape index: {}]   ;;  %s29_s1 = inlined_call_operand.vmem [shape: f32[16,8], index: 1, kind: output, shape index: {}]  }
   0x1   :  { %v4_v0 = vld [vmem:[%s28_s0] ss:$0 sm:$0xff] }
   0x2   :  { %5 = vst [vmem:[%s29_s1] sm:$0xff] %v4_v0 }
   0x3   :  { %8 = vst [vmem:[%s29_s1 + $0x8] sm:$0xff] %v4_v0 }

// kernel: tile.19
= control target key start
LH: loop header
LB: loop body
LE: loop exit
PB: predicated region body
PF: predicated region fallthrough
CT: control target
= control target key end

     0   :  { %s131_s10 = smov 120   ;;  %s132_s11 = smov 104   ;;  %vm3_vm0 = vcmask 64512   ;;  %vm9_vm1 = vcmask 1048512   ;;  %vm15_vm2 = vcmask 982912   ;;  %vm21_vm3 = vcmask 917312   ;;  %s207_s0 = inlined_call_operand.vmem [shape: f32[16,8], index: 0, kind: input, shape index: {}]   ;;  %s208_s1 = inlined_call_operand.vmem [shape: f32[1,128], index: 1, kind: output, shape index: {}]  }
   0x1   :  { %v101_v0 = vld [vmem:[%s207_s0 + $0xf] sm:$0x1]   ;;  %v103_v1 = vld [vmem:[%s207_s0 + $0xd] sm:$0x1]   ;;  %v105_v2 = vld [vmem:[%s207_s0 + $0xb] sm:$0x1]  }
   0x2   :  { %7 = vrot.lane.b32.xlu0 %v101_v0, %s131_s10  ;;  %19 = vrot.lane.b32.xlu1 %v103_v1, %s132_s11  ;;  %s133_s14 = smov 88   ;;  %v102_v3 = vld [vmem:[%s207_s0 + $0xe] sm:$0x1]   ;;  %v104_v4 = vld [vmem:[%s207_s0 + $0xc] sm:$0x1]   ;;  %s134_s19 = smov 112  }
   0x3   :  { %31 = vrot.lane.b32.xlu2 %v105_v2, %s133_s14  ;;  %s135_s20 = smov 96   ;;  %v106_v5 = vld [vmem:[%s207_s0 + $0xa] sm:$0x1]   ;;  %s136_s23 = smov 80   ;;  %v107_v6 = vld [vmem:[%s207_s0 + $0x9] sm:$0x1]  }
   0x4   :  { %v108_v7 = vld [vmem:[%s207_s0 + $0x8] sm:$0x1]   ;;  %s137_s28 = smov 72   ;;  %s138_s29 = smov 64   ;;  %v109_v8 = vld [vmem:[%s207_s0 + $0x7] sm:$0x1]  }
   0x5   :  { %s139_s3 = smov 56   ;;  %v110_v9 = vld [vmem:[%s207_s0 + $0x6] sm:$0x1]   ;;  %v111_v10 = vld [vmem:[%s207_s0 + $0x5] sm:$0x1]   ;;  %s140_s8 = smov 48  }
   0x6   :  { %s141_s9 = smov 40   ;;  %v112_v11 = vld [vmem:[%s207_s0 + $0x4] sm:$0x1]   ;;  %s142_s12 = smov 32   ;;  %v113_v12 = vld [vmem:[%s207_s0 + $0x3] sm:$0x1]  }
   0x7   :  { %v114_v13 = vld [vmem:[%s207_s0 + $0x2] sm:$0x1]   ;;  %s143_s17 = smov 24   ;;  %s144_s18 = smov 16   ;;  %v115_v14 = vld [vmem:[%s207_s0 + $0x1] sm:$0x1]  }
   0x8   :  { %s145_s21 = smov 8   ;;  %v2_v15 = vld [vmem:[%s207_s0] sm:$0x1]   ;;  %vm27_vm4 = vcmask 851712   ;;  %vm33_vm5 = vcmask 786112   ;;  %vm39_vm6 = vcmask 720512  }
   0x9   :  { %4 = vst.msk [vmem:[#allocation0] sm:$0x1] %vm3_vm0, %v2_v15   ;;  %vm45_vm7 = vcmask 654912   ;;  %vm51_vm8 = vcmask 589312   ;;  %vm57_vm9 = vcmask 523712   ;;  %vm63_vm10 = vcmask 458112  }
   0xa   :  { %13 = vrot.lane.b32.xlu0 %v102_v3, %s134_s19  ;;  %25 = vrot.lane.b32.xlu1 %v104_v4, %s135_s20  ;;  %vm69_vm11 = vcmask 392512   ;;  %vm75_vm12 = vcmask 326912   ;;  %vm81_vm13 = vcmask 261312   ;;  %vm87_vm14 = vcmask 195712  }
   0xb   :  { %37 = vrot.lane.b32.xlu2 %v106_v5, %s136_s23  ;;  %vm93_vm15 = vcmask 130112  }
  0x12   :  { %43 = vrot.lane.b32.xlu0 %v107_v6, %s137_s28  ;;  %49 = vrot.lane.b32.xlu1 %v108_v7, %s138_s29 }
  0x13   :  { %55 = vrot.lane.b32.xlu2 %v109_v8, %s139_s3 }
  0x1a   :  { %61 = vrot.lane.b32.xlu0 %v110_v9, %s140_s8  ;;  %67 = vrot.lane.b32.xlu1 %v111_v10, %s141_s9 }
  0x1b   :  { %73 = vrot.lane.b32.xlu2 %v112_v11, %s142_s12 }
  0x22   :  { %79 = vrot.lane.b32.xlu0 %v113_v12, %s143_s17  ;;  %85 = vrot.lane.b32.xlu1 %v114_v13, %s144_s18 }
  0x23   :  { %91 = vrot.lane.b32.xlu2 %v115_v14, %s145_s21 }
  0x5d   :  { %v32_v16 = vpop.permute.xlu2 %31  }
  0x65   :  { %v38_v17 = vpop.permute.xlu2 %37  }
  0x6d   :  { %v56_v18 = vpop.permute.xlu2 %55  }
  0x74   :  { %v8_v19 = vpop.permute.xlu0 %7   ;;  %v20_v20 = vpop.permute.xlu1 %19  }
  0x75   :  { %10 = vst.msk [vmem:[#allocation0] sm:$0x1] %vm9_vm1, %v8_v19   ;;  %v74_v21 = vpop.permute.xlu2 %73  }
  0x7c   :  { %v14_v22 = vpop.permute.xlu0 %13   ;;  %v26_v23 = vpop.permute.xlu1 %25  }
  0x7d   :  { %16 = vst.msk [vmem:[#allocation0] sm:$0x1] %vm15_vm2, %v14_v22   ;;  %v92_v24 = vpop.permute.xlu2 %91  }
  0x7e   :  { %22 = vst.msk [vmem:[#allocation0] sm:$0x1] %vm21_vm3, %v20_v20  }
  0x7f   :  { %28 = vst.msk [vmem:[#allocation0] sm:$0x1] %vm27_vm4, %v26_v23  }
  0x80   :  { %34 = vst.msk [vmem:[#allocation0] sm:$0x1] %vm33_vm5, %v32_v16  }
  0x81   :  { %40 = vst.msk [vmem:[#allocation0] sm:$0x1] %vm39_vm6, %v38_v17  }
  0x84   :  { %v44_v25 = vpop.permute.xlu0 %43   ;;  %v50_v26 = vpop.permute.xlu1 %49  }
  0x85   :  { %46 = vst.msk [vmem:[#allocation0] sm:$0x1] %vm45_vm7, %v44_v25  }
  0x86   :  { %52 = vst.msk [vmem:[#allocation0] sm:$0x1] %vm51_vm8, %v50_v26  }
  0x87   :  { %58 = vst.msk [vmem:[#allocation0] sm:$0x1] %vm57_vm9, %v56_v18  }
  0x8c   :  { %v62_v27 = vpop.permute.xlu0 %61   ;;  %v68_v28 = vpop.permute.xlu1 %67  }
  0x8d   :  { %64 = vst.msk [vmem:[#allocation0] sm:$0x1] %vm63_vm10, %v62_v27  }
  0x8e   :  { %70 = vst.msk [vmem:[#allocation0] sm:$0x1] %vm69_vm11, %v68_v28  }
  0x8f   :  { %76 = vst.msk [vmem:[#allocation0] sm:$0x1] %vm75_vm12, %v74_v21  }
  0x94   :  { %v80_v29 = vpop.permute.xlu0 %79   ;;  %v86_v30 = vpop.permute.xlu1 %85  }
  0x95   :  { %82 = vst.msk [vmem:[#allocation0] sm:$0x1] %vm81_vm13, %v80_v29  }
  0x96   :  { %88 = vst.msk [vmem:[#allocation0] sm:$0x1] %vm87_vm14, %v86_v30  }
  0x97   :  { %94 = vst.msk [vmem:[#allocation0] sm:$0x1] %vm93_vm15, %v92_v24  }
  0x9e   :  { %v97_v31 = vld [vmem:[#allocation0] sm:$0x1] }
  0x9f   :  { %100 = vst [vmem:[%s208_s1] sm:$0x1] %v97_v31 }

// kernel: tile.28
= control target key start
LH: loop header
LB: loop body
LE: loop exit
PB: predicated region body
PF: predicated region fallthrough
CT: control target
= control target key end

     0   :  { %s28_s0 = inlined_call_operand.vmem [shape: f32[4], index: 0, kind: input, shape index: {}]   ;;  %s29_s1 = inlined_call_operand.vmem [shape: f32[16,4], index: 1, kind: output, shape index: {}]  }
   0x1   :  { %v4_v0 = vld [vmem:[%s28_s0] ss:$0 sm:$0xff] }
   0x2   :  { %5 = vst [vmem:[%s29_s1] sm:$0xff] %v4_v0 }
   0x3   :  { %8 = vst [vmem:[%s29_s1 + $0x8] sm:$0xff] %v4_v0 }

// kernel: tile.29
= control target key start
LH: loop header
LB: loop body
LE: loop exit
PB: predicated region body
PF: predicated region fallthrough
CT: control target
= control target key end

     0   :  { %s131_s10 = smov 60   ;;  %s132_s11 = smov 52   ;;  %vm3_vm0 = vcmask 31744   ;;  %vm9_vm1 = vcmask 523744   ;;  %vm15_vm2 = vcmask 490944   ;;  %vm21_vm3 = vcmask 458144   ;;  %s207_s0 = inlined_call_operand.vmem [shape: f32[16,4], index: 0, kind: input, shape index: {}]   ;;  %s208_s1 = inlined_call_operand.vmem [shape: f32[1,64], index: 1, kind: output, shape index: {}]  }
   0x1   :  { %v101_v0 = vld [vmem:[%s207_s0 + $0xf] sm:$0x1]   ;;  %v103_v1 = vld [vmem:[%s207_s0 + $0xd] sm:$0x1]   ;;  %v105_v2 = vld [vmem:[%s207_s0 + $0xb] sm:$0x1]  }
   0x2   :  { %7 = vrot.lane.b32.xlu0 %v101_v0, %s131_s10  ;;  %19 = vrot.lane.b32.xlu1 %v103_v1, %s132_s11  ;;  %s133_s14 = smov 44   ;;  %v102_v3 = vld [vmem:[%s207_s0 + $0xe] sm:$0x1]   ;;  %v104_v4 = vld [vmem:[%s207_s0 + $0xc] sm:$0x1]   ;;  %s134_s19 = smov 56  }
   0x3   :  { %31 = vrot.lane.b32.xlu2 %v105_v2, %s133_s14  ;;  %s135_s20 = smov 48   ;;  %v106_v5 = vld [vmem:[%s207_s0 + $0xa] sm:$0x1]   ;;  %s136_s23 = smov 40   ;;  %v107_v6 = vld [vmem:[%s207_s0 + $0x9] sm:$0x1]  }
   0x4   :  { %v108_v7 = vld [vmem:[%s207_s0 + $0x8] sm:$0x1]   ;;  %s137_s28 = smov 36   ;;  %s138_s29 = smov 32   ;;  %v109_v8 = vld [vmem:[%s207_s0 + $0x7] sm:$0x1]  }
   0x5   :  { %s139_s3 = smov 28   ;;  %v110_v9 = vld [vmem:[%s207_s0 + $0x6] sm:$0x1]   ;;  %v111_v10 = vld [vmem:[%s207_s0 + $0x5] sm:$0x1]   ;;  %s140_s8 = smov 24  }
   0x6   :  { %s141_s9 = smov 20   ;;  %v112_v11 = vld [vmem:[%s207_s0 + $0x4] sm:$0x1]   ;;  %s142_s12 = smov 16   ;;  %v113_v12 = vld [vmem:[%s207_s0 + $0x3] sm:$0x1]  }
   0x7   :  { %v114_v13 = vld [vmem:[%s207_s0 + $0x2] sm:$0x1]   ;;  %s143_s17 = smov 12   ;;  %s144_s18 = smov 8   ;;  %v115_v14 = vld [vmem:[%s207_s0 + $0x1] sm:$0x1]  }
   0x8   :  { %s145_s21 = smov 4   ;;  %v2_v15 = vld [vmem:[%s207_s0] sm:$0x1]   ;;  %vm27_vm4 = vcmask 425344   ;;  %vm33_vm5 = vcmask 392544   ;;  %vm39_vm6 = vcmask 359744  }
   0x9   :  { %4 = vst.msk [vmem:[#allocation0] sm:$0x1] %vm3_vm0, %v2_v15   ;;  %vm45_vm7 = vcmask 326944   ;;  %vm51_vm8 = vcmask 294144   ;;  %vm57_vm9 = vcmask 261344   ;;  %vm63_vm10 = vcmask 228544  }
   0xa   :  { %13 = vrot.lane.b32.xlu0 %v102_v3, %s134_s19  ;;  %25 = vrot.lane.b32.xlu1 %v104_v4, %s135_s20  ;;  %vm69_vm11 = vcmask 195744   ;;  %vm75_vm12 = vcmask 162944   ;;  %vm81_vm13 = vcmask 130144   ;;  %vm87_vm14 = vcmask 97344  }
   0xb   :  { %37 = vrot.lane.b32.xlu2 %v106_v5, %s136_s23  ;;  %vm93_vm15 = vcmask 64544  }
  0x12   :  { %43 = vrot.lane.b32.xlu0 %v107_v6, %s137_s28  ;;  %49 = vrot.lane.b32.xlu1 %v108_v7, %s138_s29 }
  0x13   :  { %55 = vrot.lane.b32.xlu2 %v109_v8, %s139_s3 }
  0x1a   :  { %61 = vrot.lane.b32.xlu0 %v110_v9, %s140_s8  ;;  %67 = vrot.lane.b32.xlu1 %v111_v10, %s141_s9 }
  0x1b   :  { %73 = vrot.lane.b32.xlu2 %v112_v11, %s142_s12 }
  0x22   :  { %79 = vrot.lane.b32.xlu0 %v113_v12, %s143_s17  ;;  %85 = vrot.lane.b32.xlu1 %v114_v13, %s144_s18 }
  0x23   :  { %91 = vrot.lane.b32.xlu2 %v115_v14, %s145_s21 }
  0x5d   :  { %v32_v16 = vpop.permute.xlu2 %31  }
  0x65   :  { %v38_v17 = vpop.permute.xlu2 %37  }
  0x6d   :  { %v56_v18 = vpop.permute.xlu2 %55  }
  0x74   :  { %v8_v19 = vpop.permute.xlu0 %7   ;;  %v20_v20 = vpop.permute.xlu1 %19  }
  0x75   :  { %10 = vst.msk [vmem:[#allocation0] sm:$0x1] %vm9_vm1, %v8_v19   ;;  %v74_v21 = vpop.permute.xlu2 %73  }
  0x7c   :  { %v14_v22 = vpop.permute.xlu0 %13   ;;  %v26_v23 = vpop.permute.xlu1 %25  }
  0x7d   :  { %16 = vst.msk [vmem:[#allocation0] sm:$0x1] %vm15_vm2, %v14_v22   ;;  %v92_v24 = vpop.permute.xlu2 %91  }
  0x7e   :  { %22 = vst.msk [vmem:[#allocation0] sm:$0x1] %vm21_vm3, %v20_v20  }
  0x7f   :  { %28 = vst.msk [vmem:[#allocation0] sm:$0x1] %vm27_vm4, %v26_v23  }
  0x80   :  { %34 = vst.msk [vmem:[#allocation0] sm:$0x1] %vm33_vm5, %v32_v16  }
  0x81   :  { %40 = vst.msk [vmem:[#allocation0] sm:$0x1] %vm39_vm6, %v38_v17  }
  0x84   :  { %v44_v25 = vpop.permute.xlu0 %43   ;;  %v50_v26 = vpop.permute.xlu1 %49  }
  0x85   :  { %46 = vst.msk [vmem:[#allocation0] sm:$0x1] %vm45_vm7, %v44_v25  }
  0x86   :  { %52 = vst.msk [vmem:[#allocation0] sm:$0x1] %vm51_vm8, %v50_v26  }
  0x87   :  { %58 = vst.msk [vmem:[#allocation0] sm:$0x1] %vm57_vm9, %v56_v18  }
  0x8c   :  { %v62_v27 = vpop.permute.xlu0 %61   ;;  %v68_v28 = vpop.permute.xlu1 %67  }
  0x8d   :  { %64 = vst.msk [vmem:[#allocation0] sm:$0x1] %vm63_vm10, %v62_v27  }
  0x8e   :  { %70 = vst.msk [vmem:[#allocation0] sm:$0x1] %vm69_vm11, %v68_v28  }
  0x8f   :  { %76 = vst.msk [vmem:[#allocation0] sm:$0x1] %vm75_vm12, %v74_v21  }
  0x94   :  { %v80_v29 = vpop.permute.xlu0 %79   ;;  %v86_v30 = vpop.permute.xlu1 %85  }
  0x95   :  { %82 = vst.msk [vmem:[#allocation0] sm:$0x1] %vm81_vm13, %v80_v29  }
  0x96   :  { %88 = vst.msk [vmem:[#allocation0] sm:$0x1] %vm87_vm14, %v86_v30  }
  0x97   :  { %94 = vst.msk [vmem:[#allocation0] sm:$0x1] %vm93_vm15, %v92_v24  }
  0x9e   :  { %v97_v31 = vld [vmem:[#allocation0] sm:$0x1] }
  0x9f   :  { %100 = vst [vmem:[%s208_s1] sm:$0x1] %v97_v31 }

// kernel: high_frequency_focus.1
= control target key start
LH: loop header
LB: loop body
LE: loop exit
PB: predicated region body
PF: predicated region fallthrough
CT: control target
= control target key end

     0   :  { %s1197_s30 = smov 0   ;;  %s1672_s0 = inlined_call_operand.vmem [shape: f32[2,16,64], index: 0, kind: input, shape index: {}]   ;;  %s1673_s1 = inlined_call_operand.vmem [shape: f32[16,16], index: 1, kind: input, shape index: {}]   ;;  %s1674_s2 = inlined_call_operand.vmem [shape: f32[64,64], index: 2, kind: input, shape index: {}]   ;;  %s1675_s3 = inlined_call_operand.vmem [shape: f32[3,64,256], index: 3, kind: input, shape index: {}]   ;;  %s1676_s4 = inlined_call_operand.vmem [shape: f32[3,64,128], index: 4, kind: input, shape index: {}]   ;;  %s1677_s5 = inlined_call_operand.vmem [shape: f32[3,128,64], index: 5, kind: input, shape index: {}]   ;;  %s1678_s6 = inlined_call_operand.vmem [shape: f32[1,128], index: 6, kind: input, shape index: {}]   ;;  %s1679_s7 = inlined_call_operand.vmem [shape: f32[1,128], index: 7, kind: input, shape index: {}]   ;;  %s1680_s8 = inlined_call_operand.vmem [shape: f32[1,64], index: 8, kind: input, shape index: {}]   ;;  %s1681_s9 = inlined_call_operand.vmem [shape: f32[2,16,64], index: 9, kind: output, shape index: {}]  }
   0x1 LB: > { %s1001_s10 = sadd.s32 4294967295, %s1144_s30   ;;  %p1005_p0 = scmp.ge.s32.totalorder %s1144_s30, 1  ;;  %s1144_s30 = sphi %s1197_s30, %s19_s30  }
   0x2   : > { %p287_p1 = scmp.lt.s32.totalorder %s1144_s30, 3 }
   0x4   : > { %p288_p2 = pnand %p1005_p0, %p287_p1 }
   0x5   : > { %p323_p3 = scmp.lt.s32.totalorder (!%p288_p2), %s1001_s10, 1 }
   0x6   : > { %291 = sbr.rel (%p288_p2) target bundleno = 626 (0x272), region = 56 }
   0xb   : > { %v374_v0 = vld [vmem:[%s1674_s2 + $0x38] sm:$0xff]  ;;  %v373_v1 = vld [vmem:[%s1674_s2 + $0x30] sm:$0xff]  ;;  %s1683_s10 = smov (!%p323_p3, %s1001_s10), 1  ;;  %v372_v2 = vld [vmem:[%s1674_s2 + $0x28] sm:$0xff]  ;;  %vm375_vm0 = vcmask 523264   ;;  %vm337_vm1 = vcmask 130048  }
   0xc   : > { %390 = vmatpush.msra.mxu2 %v374_v0  ;;  %s1116_s17 = sshll.u32 %s1683_s10, 4  ;;  %v371_v3 = vld [vmem:[%s1674_s2 + $0x20] sm:$0xff]  ;;  %v370_v6 = vld [vmem:[%s1674_s2 + $0x18] sm:$0xff]  ;;  %v369_v8 = vld [vmem:[%s1674_s2 + $0x10] sm:$0xff]  ;;  %vm407_vm2 = vcmask 516096   ;;  %v1146_v16 = vmov 0.0  }
   0xd   : > { %s327_s22 = scalar_lea.vmem %s1672_s0, %s1116_s17  ;;  %v335_v7 = vld [vmem:[%s1673_s1] sm:$0xff]  ;;  %v368_v9 = vld [vmem:[%s1674_s2 + $0x8] sm:$0xff]  ;;  %v432_v12 = vld [vmem:[%s1675_s3 + $0x70] sm:$0xff]  ;;  %408 = vst.msk [vmem:[#allocation2] sm:$0x1] %vm407_vm2, %v1146_v16  ;;  %s332_s12 = scalar_lea.vmem %s1681_s9, %s1116_s17 }
   0xe   : > { %391 = vmatpush.msra.mxu2 %v373_v1  ;;  %v1225_v4 = vld [vmem:[%s327_s22 + $0x8] sm:$0xff]  ;;  %v1227_v5 = vld [vmem:[%s327_s22] sm:$0xff]  ;;  %v1028_v14 = vld [vmem:[%s1675_s3 + $0xf0] sm:$0xff]  ;;  %409 = vst.msk [vmem:[#allocation2 + $0x11] sm:$0x1] %vm407_vm2, %v1146_v16 }
   0xf   : > { %358 = vmatpush.msra.mxu0 %v1225_v4  ;;  %411 = vst.msk [vmem:[#allocation2 + $0x9] sm:$0xff] %vm375_vm0, %v1225_v4  ;;  %v336_v10 = vld [vmem:[%s1673_s1 + $0x8] sm:$0xff]  ;;  %v367_v11 = vld [vmem:[%s1674_s2] sm:$0xff]  ;;  %v1029_v15 = vld [vmem:[%s1675_s3 + $0xf8] sm:$0xff] }
  0x10   : > { %392 = vmatpush.msra.mxu2 %v372_v2  ;;  %410 = vst.msk [vmem:[#allocation2 + $0x1] sm:$0xff] %vm375_vm0, %v1227_v5  ;;  %v430_v13 = vld [vmem:[%s1675_s3 + $0x60] sm:$0xff]  ;;  %v428_v17 = vld [vmem:[%s1675_s3 + $0x50] sm:$0xff]  ;;  %500 = vmatpush.msra.mxu3 %v1029_v15  ;;  %v1027_v19 = vld [vmem:[%s1675_s3 + $0xe8] sm:$0xff] }
  0x11   : > { %359 = vmatpush.msra.mxu0 %v1227_v5  ;;  %v1026_v18 = vld [vmem:[%s1675_s3 + $0xe0] sm:$0xff]  ;;  %v1024_v20 = vld [vmem:[%s1675_s3 + $0xd0] sm:$0xff]  ;;  %v1025_v21 = vld [vmem:[%s1675_s3 + $0xd8] sm:$0xff]  ;;  %412 = vst.msk [vmem:[#allocation3] sm:$0x1] %vm407_vm2, %v1146_v16 }
  0x12   : > { %393 = vmatpush.msra.mxu2 %v371_v3  ;;  %1010 = vmatmul.msk.f32.vlgmr.msra.gmra.mxu0 %vm337_vm1, %v335_v7  ;;  %v426_v22 = vld [vmem:[%s1675_s3 + $0x40] sm:$0xff]  ;;  %413 = vst.msk [vmem:[#allocation3 + $0x11] sm:$0x1] %vm407_vm2, %v1146_v16  ;;  %v1023_v24 = vld [vmem:[%s1675_s3 + $0xc8] sm:$0xff]  ;;  %v433_v25 = vld [vmem:[%s1675_s3 + $0x78] sm:$0xff] }
  0x13   : > { %529 = vmatpush.msrb.mxu0 %v432_v12  ;;  %501 = vmatpush.msra.mxu3 %v1027_v19  ;;  %v1022_v23 = vld [vmem:[%s1675_s3 + $0xc0] sm:$0xff]  ;;  %807 = vst [vmem:[#allocation4] sm:$0x1] %v1146_v16  ;;  %v424_v26 = vld [vmem:[%s1675_s3 + $0x30] sm:$0xff]  ;;  %v431_v27 = vld [vmem:[%s1675_s3 + $0x68] sm:$0xff] }
  0x14   : > { %394 = vmatpush.msra.mxu2 %v370_v6  ;;  %808 = vst [vmem:[#allocation4 + $0x11] sm:$0x1] %v1146_v16  ;;  %552 = vmatpush.msra.mxu1 %v433_v25  ;;  %v1020_v28 = vld [vmem:[%s1675_s3 + $0xb0] sm:$0xff]  ;;  %v1021_v29 = vld [vmem:[%s1675_s3 + $0xb8] sm:$0xff]  ;;  %v422_v30 = vld [vmem:[%s1675_s3 + $0x20] sm:$0xff] }
  0x15   : > { %530 = vmatpush.msrb.mxu0 %v430_v13  ;;  %502 = vmatpush.msra.mxu3 %v1025_v21  ;;  %v429_v31 = vld [vmem:[%s1675_s3 + $0x58] sm:$0xff]  ;;  %v1018_v32 = vld [vmem:[%s1675_s3 + $0xa0] sm:$0xff]  ;;  %v1019_v33 = vld [vmem:[%s1675_s3 + $0xa8] sm:$0xff] }
  0x16   : > { %395 = vmatpush.msra.mxu2 %v369_v8  ;;  %553 = vmatpush.msra.mxu1 %v431_v27  ;;  %v420_v34 = vld [vmem:[%s1675_s3 + $0x10] sm:$0xff]  ;;  %v427_v35 = vld [vmem:[%s1675_s3 + $0x48] sm:$0xff]  ;;  %v1017_v37 = vld [vmem:[%s1675_s3 + $0x98] sm:$0xff] }
  0x17   : > { %531 = vmatpush.msrb.mxu0 %v428_v17  ;;  %503 = vmatpush.msra.mxu3 %v1023_v24  ;;  %v1016_v36 = vld [vmem:[%s1675_s3 + $0x90] sm:$0xff]  ;;  %v418_v38 = vld [vmem:[%s1675_s3] sm:$0xff]  ;;  %v425_v39 = vld [vmem:[%s1675_s3 + $0x38] sm:$0xff] }
  0x18   : > { %396 = vmatpush.msra.mxu2 %v368_v9  ;;  %554 = vmatpush.msra.mxu1 %v429_v31  ;;  %v416_v40 = vld [vmem:[#allocation2] sm:$0xff]  ;;  %v1064_v42 = vld [vmem:[%s1675_s3 + $0x170] sm:$0xff]  ;;  %v1015_v43 = vld [vmem:[%s1675_s3 + $0x88] sm:$0xff] }
  0x19   : > { %532 = vmatpush.msrb.mxu0 %v426_v22  ;;  %504 = vmatpush.msra.mxu3 %v1021_v29  ;;  %v1014_v41 = vld [vmem:[%s1675_s3 + $0x80] sm:$0xff]  ;;  %v423_v45 = vld [vmem:[%s1675_s3 + $0x28] sm:$0xff]  ;;  %v443_v47 = vld [vmem:[%s1676_s4 + $0x38] sm:$0xff] }
  0x1a   : > { %1011 = vmatmul.msk.f32.gmra.mxu0 %vm337_vm1, %v336_v10  ;;  %397 = vmatpush.msra.mxu2 %v367_v11  ;;  %v444_v44 = vld [vmem:[#allocation2 + $0x1] sm:$0xff]  ;;  %v421_v48 = vld [vmem:[%s1675_s3 + $0x18] sm:$0xff]  ;;  %v1060_v49 = vld [vmem:[%s1675_s3 + $0x150] sm:$0xff] }
  0x1b   : > { %533 = vmatpush.msrb.mxu0 %v424_v26  ;;  %505 = vmatpush.msra.mxu3 %v1019_v33  ;;  %v1062_v46 = vld [vmem:[%s1675_s3 + $0x160] sm:$0xff]  ;;  %v442_v50 = vld [vmem:[%s1676_s4 + $0x30] sm:$0xff]  ;;  %v417_v52 = vld [vmem:[#allocation2 + $0x8] sm:$0xff] }
  0x1c   : > { %477 = vmatpush.msrb.mxu2 %v1028_v14  ;;  %555 = vmatpush.msra.mxu1 %v427_v35  ;;  %v1058_v51 = vld [vmem:[%s1675_s3 + $0x140] sm:$0xff]  ;;  %v1045_v53 = vld [vmem:[%s1676_s4 + $0x78] sm:$0xff]  ;;  %v1056_v54 = vld [vmem:[%s1675_s3 + $0x130] sm:$0xff] }
  0x1d   : > { %534 = vmatpush.msrb.mxu0 %v422_v30  ;;  %506 = vmatpush.msra.mxu3 %v1017_v37  ;;  %v1044_v56 = vld [vmem:[%s1676_s4 + $0x70] sm:$0xff]  ;;  %v1054_v57 = vld [vmem:[%s1675_s3 + $0x120] sm:$0xff]  ;;  %v1043_v58 = vld [vmem:[%s1676_s4 + $0x68] sm:$0xff] }
  0x1e   : > { %478 = vmatpush.msrb.mxu2 %v1026_v18  ;;  %556 = vmatpush.msra.mxu1 %v425_v39  ;;  %v419_v60 = vld [vmem:[%s1675_s3 + $0x8] sm:$0xff]  ;;  %v1052_v62 = vld [vmem:[%s1675_s3 + $0x110] sm:$0xff]  ;;  %v1042_v63 = vld [vmem:[%s1676_s4 + $0x60] sm:$0xff] }
  0x1f   : > { %535 = vmatpush.msrb.mxu0 %v420_v34  ;;  %507 = vmatpush.msra.mxu3 %v1015_v43  ;;  %v441_v61 = vld [vmem:[%s1676_s4 + $0x28] sm:$0xff]  ;;  %v440_v0 = vld [vmem:[%s1676_s4 + $0x20] sm:$0xff]  ;;  %v1065_v2 = vld [vmem:[%s1675_s3 + $0x178] sm:$0xff] }
  0x20   : > { %479 = vmatpush.msrb.mxu2 %v1024_v20  ;;  %1032 = vmatmul.msk.f32.vlgmr.msra.gmra.mxu3 %vm375_vm0, %v444_v44  ;;  %v1050_v1 = vld [vmem:[%s1675_s3 + $0x100] sm:$0xff]  ;;  %v445_v3 = vld [vmem:[#allocation2 + $0x9] sm:$0xff]  ;;  %v1041_v7 = vld [vmem:[%s1676_s4 + $0x58] sm:$0xff] }
  0x21   : > { %536 = vmatpush.msrb.mxu0 %v418_v38  ;;  %557 = vmatpush.msra.mxu1 %v423_v45  ;;  %v636_v6 = vld [vmem:[#allocation2 + $0x2] sm:$0xff]  ;;  %v439_v8 = vld [vmem:[%s1676_s4 + $0x18] sm:$0xff]  ;;  %v1040_v10 = vld [vmem:[%s1676_s4 + $0x50] sm:$0xff] }
  0x22   : > { %480 = vmatpush.msrb.mxu2 %v1022_v23  ;;  %1034 = vmatmul.msk.f32.vlgmr.msrb.gmra.mxu0 %vm375_vm0, %v416_v40  ;;  %v1063_v9 = vld [vmem:[%s1675_s3 + $0x168] sm:$0xff]  ;;  %v438_v11 = vld [vmem:[%s1676_s4 + $0x10] sm:$0xff]  ;;  %v1061_v12 = vld [vmem:[%s1675_s3 + $0x158] sm:$0xff] }
  0x23   : > { %669 = vmatpush.msra.mxu0 %v1064_v42  ;;  %621 = vmatpush.msrb.mxu3 %v443_v47  ;;  %v1039_v13 = vld [vmem:[%s1676_s4 + $0x48] sm:$0xff]  ;;  %v1038_v16 = vld [vmem:[%s1676_s4 + $0x40] sm:$0xff]  ;;  %v1057_v18 = vld [vmem:[%s1675_s3 + $0x138] sm:$0xff] }
  0x24   : > { %481 = vmatpush.msrb.mxu2 %v1020_v28  ;;  %558 = vmatpush.msra.mxu1 %v421_v48  ;;  %v437_v14 = vld [vmem:[%s1676_s4 + $0x8] sm:$0xff]  ;;  %v436_v17 = vld [vmem:[%s1676_s4] sm:$0xff]  ;;  %v1077_v20 = vld [vmem:[%s1676_s4 + $0xb8] sm:$0xff] }
  0x25   : > { %670 = vmatpush.msra.mxu0 %v1062_v46  ;;  %622 = vmatpush.msrb.mxu3 %v442_v50  ;;  %v1059_v15 = vld [vmem:[%s1675_s3 + $0x148] sm:$0xff]  ;;  %v1076_v22 = vld [vmem:[%s1676_s4 + $0xb0] sm:$0xff]  ;;  %v1053_v23 = vld [vmem:[%s1675_s3 + $0x118] sm:$0xff] }
  0x26   : > { %482 = vmatpush.msrb.mxu2 %v1018_v32  ;;  %559 = vmatpush.msra.mxu1 %v419_v60  ;;  %v637_v19 = vld [vmem:[#allocation2 + $0xa] sm:$0xff]  ;;  %v1074_v26 = vld [vmem:[%s1676_s4 + $0xa0] sm:$0xff]  ;;  %v1073_v27 = vld [vmem:[%s1676_s4 + $0x98] sm:$0xff] }
  0x27   : > { %671 = vmatpush.msra.mxu0 %v1060_v49  ;;  %623 = vmatpush.msrb.mxu3 %v441_v61  ;;  %v1055_v21 = vld [vmem:[%s1675_s3 + $0x128] sm:$0xff]  ;;  %v1072_v28 = vld [vmem:[%s1676_s4 + $0x90] sm:$0xff]  ;;  %v1070_v30 = vld [vmem:[%s1676_s4 + $0x80] sm:$0xff] }
  0x28   : > { %483 = vmatpush.msrb.mxu2 %v1016_v36  ;;  %1036 = vmatmul.msk.f32.vlgmr.msra.gmra.mxu1 %vm375_vm0, %v416_v40  ;;  %v1075_v24 = vld [vmem:[%s1676_s4 + $0xa8] sm:$0xff]  ;;  %v1097_v42 = vld [vmem:[%s1677_s5 + $0xf8] sm:$0xff]  ;;  %v1094_v46 = vld [vmem:[%s1677_s5 + $0xe0] sm:$0xff] }
  0x29   : > { %672 = vmatpush.msra.mxu0 %v1058_v51  ;;  %624 = vmatpush.msrb.mxu3 %v440_v0  ;;  %v1051_v25 = vld [vmem:[%s1675_s3 + $0x108] sm:$0xff]  ;;  %v828_v47 = vld [vmem:[%s1677_s5 + $0x78] sm:$0xff]  ;;  %v827_v51 = vld [vmem:[%s1677_s5 + $0x70] sm:$0xff] }
  0x2a   : > { %484 = vmatpush.msrb.mxu2 %v1014_v41  ;;  %1035 = vmatmul.msk.f32.gmra.mxu0 %vm375_vm0, %v417_v52  ;;  %v1071_v29 = vld [vmem:[%s1676_s4 + $0x88] sm:$0xff]  ;;  %v1093_v48 = vld [vmem:[%s1677_s5 + $0xd8] sm:$0xff]  ;;  %v1088_v0 = vld [vmem:[%s1677_s5 + $0xb0] sm:$0xff] }
  0x2b   : > { %673 = vmatpush.msra.mxu0 %v1056_v54  ;;  %692 = vmatpush.msrb.mxu1 %v1065_v2  ;;  %v1095_v45 = vld [vmem:[%s1677_s5 + $0xe8] sm:$0xff]  ;;  %v1089_v60 = vld [vmem:[%s1677_s5 + $0xb8] sm:$0xff] }
  0x2c   : > { %1033 = vmatmul.msk.f32.gmra.mxu3 %vm375_vm0, %v445_v3  ;;  %v826_v54 = vld [vmem:[%s1677_s5 + $0x68] sm:$0xff] }
  0x2d   : > { %674 = vmatpush.msra.mxu0 %v1054_v57  ;;  %625 = vmatpush.msrb.mxu3 %v439_v8  ;;  %v1090_v57 = vld [vmem:[%s1677_s5 + $0xc0] sm:$0xff]  ;;  %v822_v2 = vld [vmem:[%s1677_s5 + $0x48] sm:$0xff] }
  0x2e   : > { %693 = vmatpush.msrb.mxu1 %v1063_v9  ;;  %v821_v8 = vld [vmem:[%s1677_s5 + $0x40] sm:$0xff] }
  0x2f   : > { %675 = vmatpush.msra.mxu0 %v1052_v62  ;;  %626 = vmatpush.msrb.mxu3 %v438_v11  ;;  %v823_v62 = vld [vmem:[%s1677_s5 + $0x50] sm:$0xff]  ;;  %v1110_v9 = vld [vmem:[%s1677_s5 + $0x160] sm:$0xff] }
  0x30   : > { %694 = vmatpush.msrb.mxu1 %v1061_v12  ;;  %v820_v12 = vld [vmem:[%s1677_s5 + $0x38] sm:$0xff] }
  0x31   : > { %676 = vmatpush.msra.mxu0 %v1050_v1  ;;  %1037 = vmatmul.msk.f32.gmra.mxu1 %vm375_vm0, %v417_v52  ;;  %v1092_v52 = vld [vmem:[%s1677_s5 + $0xd0] sm:$0xff] }
  0x32   : > { %1066 = vmatmul.msk.f32.vlgmr.msra.gmra.mxu0 %vm375_vm0, %v636_v6  ;;  %627 = vmatpush.msrb.mxu3 %v437_v14  ;;  %v1085_v14 = vld [vmem:[%s1677_s5 + $0x98] sm:$0xff] }
  0x33   : > { %695 = vmatpush.msrb.mxu1 %v1059_v15  ;;  %871 = vmatpush.msrb.mxu0 %v828_v47  ;;  %v1102_v47 = vld [vmem:[%s1677_s5 + $0x120] sm:$0xff] }
  0x34   : > { %628 = vmatpush.msrb.mxu3 %v436_v17  ;;  %v819_v17 = vld [vmem:[%s1677_s5 + $0x30] sm:$0xff] }
  0x35   : > { %696 = vmatpush.msrb.mxu1 %v1057_v18  ;;  %872 = vmatpush.msrb.mxu0 %v827_v51  ;;  %v1108_v18 = vld [vmem:[%s1677_s5 + $0x150] sm:$0xff] }
  0x36   : > { %848 = vmatpush.msra.mxu3 %v1097_v42 }
  0x37   : > { %697 = vmatpush.msrb.mxu1 %v1055_v21  ;;  %873 = vmatpush.msrb.mxu0 %v826_v54 }
  0x39   : > { %698 = vmatpush.msrb.mxu1 %v1053_v23  ;;  %v818_v23 = vld [vmem:[%s1677_s5 + $0x28] sm:$0xff] }
  0x3a   : > { %1067 = vmatmul.msk.f32.gmra.mxu0 %vm375_vm0, %v637_v19 }
  0x3b   : > { %699 = vmatpush.msrb.mxu1 %v1051_v25  ;;  %v1083_v25 = vld [vmem:[%s1677_s5 + $0x88] sm:$0xff] }
  0x3c   : > { %1068 = vmatmul.msk.f32.vlgmr.msrb.gmra.mxu1 %vm375_vm0, %v636_v6  ;;  %v1087_v6 = vld [vmem:[%s1677_s5 + $0xa8] sm:$0xff] }
  0x44   : > { %1069 = vmatmul.msk.f32.gmra.mxu1 %vm375_vm0, %v637_v19  ;;  %v1084_v19 = vld [vmem:[%s1677_s5 + $0x90] sm:$0xff] }
  0x8f   : > { %v361_v55 = vpop.f32.mrf.mxu0 }
  0x90   : > { %1012 = vmatmul.msk.f32.vlgmr.msra.gmra.mxu2 %vm375_vm0, %v361_v55  ;;  %v1091_v55 = vld [vmem:[%s1677_s5 + $0xc8] sm:$0xff] }
  0x91   : > { %592 = vmatpush.msra.mxu2 %v1045_v53 }
  0x93   : > { %593 = vmatpush.msra.mxu2 %v1044_v56  ;;  %v825_v56 = vld [vmem:[%s1677_s5 + $0x60] sm:$0xff] }
  0x94   : > { %874 = vmatpush.msrb.mxu0 %v825_v56  ;;  %v1099_v56 = vld [vmem:[%s1677_s5 + $0x108] sm:$0xff] }
  0x95   : > { %594 = vmatpush.msra.mxu2 %v1043_v58  ;;  %v824_v58 = vld [vmem:[%s1677_s5 + $0x58] sm:$0xff] }
  0x96   : > { %875 = vmatpush.msrb.mxu0 %v824_v58 }
  0x97   : > { %v364_v59 = vpop.f32.mrf.mxu0  ;;  %595 = vmatpush.msra.mxu2 %v1042_v63  ;;  %v1112_v63 = vld [vmem:[%s1677_s5 + $0x170] sm:$0xff] }
  0x98   : > { %1013 = vmatmul.msk.f32.gmra.mxu2 %vm375_vm0, %v364_v59  ;;  %v1113_v59 = vld [vmem:[%s1677_s5 + $0x178] sm:$0xff]  ;;  %876 = vmatpush.msrb.mxu0 %v823_v62 }
  0x99   : > { %596 = vmatpush.msra.mxu2 %v1041_v7  ;;  %913 = vmatpush.msra.mxu1 %v1113_v59 }
  0x9a   : > { %877 = vmatpush.msrb.mxu0 %v822_v2 }
  0x9b   : > { %597 = vmatpush.msra.mxu2 %v1040_v10  ;;  %914 = vmatpush.msra.mxu1 %v1112_v63  ;;  %v1086_v10 = vld [vmem:[%s1677_s5 + $0xa0] sm:$0xff] }
  0x9c   : > { %878 = vmatpush.msrb.mxu0 %v821_v8 }
  0x9d   : > { %598 = vmatpush.msra.mxu2 %v1039_v13  ;;  %v1109_v13 = vld [vmem:[%s1677_s5 + $0x158] sm:$0xff] }
  0x9e   : > { %879 = vmatpush.msrb.mxu0 %v820_v12 }
  0x9f   : > { %599 = vmatpush.msra.mxu2 %v1038_v16  ;;  %v538_v43 = vpop.f32.mrf.mxu0 }
  0xa0   : > { %1030 = vmatmul.msk.f32.vlgmr.msrb.gmra.mxu2 %vm375_vm0, %v444_v44  ;;  %v1096_v44 = vld [vmem:[%s1677_s5 + $0xf0] sm:$0xff]  ;;  %880 = vmatpush.msrb.mxu0 %v819_v17 }
  0xa1   : > { %736 = vmatpush.msrb.mxu2 %v1077_v20  ;;  %849 = vmatpush.msra.mxu3 %v1096_v44  ;;  %v1103_v44 = vld [vmem:[%s1677_s5 + $0x128] sm:$0xff] }
  0xa2   : > { %881 = vmatpush.msrb.mxu0 %v818_v23 }
  0xa3   : > { %737 = vmatpush.msrb.mxu2 %v1076_v22  ;;  %v1497_v40 = vpop.f32.mrf.mxu3  ;;  %850 = vmatpush.msra.mxu3 %v1095_v45  ;;  %v1128_v22 = vld [vmem:[%s1678_s6] ss:$0 sm:$0xff] }
  0xa5   : > { %738 = vmatpush.msrb.mxu2 %v1075_v24  ;;  %851 = vmatpush.msra.mxu3 %v1094_v46  ;;  %v1107_v24 = vld [vmem:[%s1677_s5 + $0x148] sm:$0xff]  ;;  %v813_v46 = vld [vmem:[%s1677_s5] sm:$0xff] }
  0xa7   : > { %739 = vmatpush.msrb.mxu2 %v1074_v26  ;;  %852 = vmatpush.msra.mxu3 %v1093_v48  ;;  %v1527_v53 = vpop.f32.mrf.mxu0 }
  0xa8   : > { %1031 = vmatmul.msk.f32.gmra.mxu2 %vm375_vm0, %v445_v3  ;;  %v1111_v3 = vld [vmem:[%s1677_s5 + $0x168] sm:$0xff] }
  0xa9   : > { %740 = vmatpush.msrb.mxu2 %v1073_v27  ;;  %853 = vmatpush.msra.mxu3 %v1092_v52  ;;  %v561_v27 = vpop.f32.mrf.mxu1  ;;  %v1100_v52 = vld [vmem:[%s1677_s5 + $0x110] sm:$0xff] }
  0xaa   : > { %915 = vmatpush.msra.mxu1 %v1111_v3  ;;  %v562_v62 = vadd.f32 %v561_v27, %v1497_v40  ;;  %v1127_v3 = vld [vmem:[%s1679_s7] ss:$0 sm:$0xff] }
  0xab   : > { %741 = vmatpush.msrb.mxu2 %v1072_v28  ;;  %854 = vmatpush.msra.mxu3 %v1091_v55 }
  0xac   : > { %916 = vmatpush.msra.mxu1 %v1110_v9 }
  0xad   : > { %742 = vmatpush.msrb.mxu2 %v1071_v29  ;;  %855 = vmatpush.msra.mxu3 %v1090_v57  ;;  %v817_v29 = vld [vmem:[%s1677_s5 + $0x20] sm:$0xff] }
  0xae   : > { %917 = vmatpush.msra.mxu1 %v1109_v13  ;;  %882 = vmatpush.msrb.mxu0 %v817_v29  ;;  %v1098_v57 = vld [vmem:[%s1677_s5 + $0x100] sm:$0xff] }
  0xaf   : > { %743 = vmatpush.msrb.mxu2 %v1070_v30  ;;  %v1519_v49 = vpop.f32.mrf.mxu3  ;;  %856 = vmatpush.msra.mxu3 %v1089_v60  ;;  %v678_v7 = vpop.f32.mrf.mxu0  ;;  %v1106_v30 = vld [vmem:[%s1677_s5 + $0x140] sm:$0xff] }
  0xb0   : > { %918 = vmatpush.msra.mxu1 %v1108_v18 }
  0xb1   : > { %857 = vmatpush.msra.mxu3 %v1088_v0  ;;  %v564_v51 = vpop.f32.mrf.mxu1 }
  0xb2   : > { %919 = vmatpush.msra.mxu1 %v1107_v24 }
  0xb3   : > { %858 = vmatpush.msra.mxu3 %v1087_v6 }
  0xb4   : > { %920 = vmatpush.msra.mxu1 %v1106_v30 }
  0xb5   : > { %859 = vmatpush.msra.mxu3 %v1086_v10  ;;  %v565_v10 = vadd.f32 %v564_v51, %v1519_v49 }
  0xb7   : > { %860 = vmatpush.msra.mxu3 %v1085_v14 }
  0xb9   : > { %861 = vmatpush.msra.mxu3 %v1084_v19  ;;  %v701_v60 = vpop.f32.mrf.mxu1 }
  0xba   : > { %v708_v2 = vadd.f32 %v701_v60, %v562_v62 }
  0xbb   : > { %862 = vmatpush.msra.mxu3 %v1083_v25 }
  0xbc   : > { %v765_v40 = vadd.f32 %v1127_v3, %v708_v2 }
  0xc1   : > { %v704_v14 = vpop.f32.mrf.mxu1 }
  0xc2   : > { %v710_v19 = vadd.f32 %v704_v14, %v565_v10 }
  0xc4   : > { %v766_v23 = vadd.f32 %v1127_v3, %v710_v19 }
 0x113   : > { %v399_v31 = vpop.f32.mrf.mxu2 }
 0x114   : > { %v405_v32 = vsub.f32 %v1227_v5, %v399_v31  ;;  %v1082_v31 = vld [vmem:[%s1677_s5 + $0x80] sm:$0xff] }
 0x115   : > { %863 = vmatpush.msra.mxu3 %v1082_v31 }
 0x116   : > { %414 = vst.msk [vmem:[#allocation3 + $0x1] sm:$0xff] %vm375_vm0, %v405_v32 }
 0x11b   : > { %v402_v33 = vpop.f32.mrf.mxu2 }
 0x11c   : > { %v406_v34 = vsub.f32 %v1225_v4, %v402_v33 }
 0x11d   : > { %v567_v35 = vld [vmem:[#allocation3 + $0x1] sm:$0xff] }
 0x11e   : > { %v434_v36 = vld [vmem:[#allocation3] sm:$0xff]  ;;  %415 = vst.msk [vmem:[#allocation3 + $0x9] sm:$0xff] %vm375_vm0, %v406_v34  ;;  %1046 = vmatmul.msk.f32.vlgmr.msra.gmra.mxu2 %vm375_vm0, %v567_v35  ;;  %v681_v34 = vpop.f32.mrf.mxu0 }
 0x11f   : > { %1048 = vmatmul.msk.f32.vlgmr.msrb.gmra.mxu3 %vm375_vm0, %v434_v36  ;;  %v816_v35 = vld [vmem:[%s1677_s5 + $0x18] sm:$0xff] }
 0x120   : > { %v1105_v36 = vld [vmem:[%s1677_s5 + $0x138] sm:$0xff]  ;;  %883 = vmatpush.msrb.mxu0 %v816_v35 }
 0x121   : > { %921 = vmatpush.msra.mxu1 %v1105_v36 }
 0x123   : > { %v486_v4 = vpop.f32.mrf.mxu2 }
 0x124   : > { %v539_v11 = vadd.f32 %v538_v43, %v486_v4  ;;  %v1104_v4 = vld [vmem:[%s1677_s5 + $0x130] sm:$0xff]  ;;  %v814_v43 = vld [vmem:[%s1677_s5 + $0x8] sm:$0xff] }
 0x125   : > { %v568_v37 = vld [vmem:[#allocation3 + $0x9] sm:$0xff]  ;;  %922 = vmatpush.msra.mxu1 %v1104_v4 }
 0x126   : > { %v435_v38 = vld [vmem:[#allocation3 + $0x8] sm:$0xff]  ;;  %1047 = vmatmul.msk.f32.gmra.mxu2 %vm375_vm0, %v568_v37  ;;  %v707_v20 = vadd.f32 %v678_v7, %v539_v11 }
 0x127   : > { %1049 = vmatmul.msk.f32.gmra.mxu3 %vm375_vm0, %v435_v38  ;;  %v711_v5 = vld [vmem:[#allocation3 + $0x2] sm:$0xff]  ;;  %v712_v39 = vld [vmem:[#allocation3 + $0xa] sm:$0xff]  ;;  %923 = vmatpush.msra.mxu1 %v1103_v44 }
 0x129   : > { %924 = vmatpush.msra.mxu1 %v1102_v47 }
 0x12b   : > { %v1499_v41 = vpop.f32.mrf.mxu2 }
 0x12c   : > { %v542_v32 = vadd.f32 %v1527_v53, %v1499_v41 }
 0x12e   : > { %1078 = vmatmul.msk.f32.vlgmr.msrb.gmra.mxu2 %vm375_vm0, %v711_v5  ;;  %v709_v41 = vadd.f32 %v681_v34, %v542_v32  ;;  %v1129_v34 = vld [vmem:[%s1680_s8] ss:$0 sm:$0xff] }
 0x136   : > { %1079 = vmatmul.msk.f32.gmra.mxu2 %vm375_vm0, %v712_v39  ;;  %v815_v39 = vld [vmem:[%s1677_s5 + $0x10] sm:$0xff] }
 0x137   : > { %884 = vmatpush.msrb.mxu0 %v815_v39 }
 0x139   : > { %885 = vmatpush.msrb.mxu0 %v814_v43 }
 0x13b   : > { %886 = vmatpush.msrb.mxu0 %v813_v46 }
 0x1a1   : > { %v601_v50 = vpop.f32.mrf.mxu2 }
 0x1a2   : > { %v630_v1 = vpop.f32.mrf.mxu3 }
 0x1a3   : > { %v631_v15 = vadd.f32 %v630_v1, %v601_v50  ;;  %v1101_v50 = vld [vmem:[%s1677_s5 + $0x118] sm:$0xff] }
 0x1a4   : > { %925 = vmatpush.msra.mxu1 %v1101_v50 }
 0x1a6   : > { %926 = vmatpush.msra.mxu1 %v1100_v52 }
 0x1a8   : > { %927 = vmatpush.msra.mxu1 %v1099_v56 }
 0x1a9   : > { %v604_v61 = vpop.f32.mrf.mxu2 }
 0x1aa   : > { %v633_v28 = vpop.f32.mrf.mxu3  ;;  %928 = vmatpush.msra.mxu1 %v1098_v57 }
 0x1ab   : > { %v634_v37 = vadd.f32 %v633_v28, %v604_v61 }
 0x1b1   : > { %v745_v16 = vpop.f32.mrf.mxu2 }
 0x1b2   : > { %v751_v21 = vadd.f32 %v745_v16, %v631_v15 }
 0x1b4   : > { %v753_v26 = vadd.f32 %v751_v21, %v707_v20 }
 0x1b6   : > { %v759_v33 = vadd.f32 %v1128_v22, %v753_v26 }
 0x1b8   : > { %v1080_v38 = vmul.f32 -1.442695, %v759_v33 }
 0x1b9   : > { %v748_v5 = vpop.f32.mrf.mxu2 }
 0x1ba   : > { %1130 = vpow2.f32 %v1080_v38  ;;  %v752_v42 = vadd.f32 %v748_v5, %v634_v37 }
 0x1bc   : > { %v754_v45 = vadd.f32 %v752_v42, %v709_v41 }
 0x1be   : > { %v760_v48 = vadd.f32 %v1128_v22, %v754_v45 }
 0x1c0   : > { %v1131_v53 = vpop.eup %1130  ;;  %v1081_v54 = vmul.f32 -1.442695, %v760_v48 }
 0x1c1   : > { %v773_v55 = vadd.f32 1.0, %v1131_v53 }
 0x1c2   : > { %1132 = vpow2.f32 %v1081_v54 }
 0x1c3   : > { %1134 = vrcp.f32 %v773_v55  ;;  %v786_v1 = vand.u32 2147483648, %v773_v55  ;;  %v784_v7 = vand.u32 2147483647, %v773_v55  ;;  %vm780_vm4 = vweird.f32 %v773_v55 }
 0x1c5   : > { %v787_v11 = vor.u32 1.1754944e-38, %v786_v1  ;;  %vm785_vm6 = vcmp.eq.f32.partialorder %v784_v7, 8.507059e+37 }
 0x1c8   : > { %v1133_v58 = vpop.eup %1132 }
 0x1c9   : > { %v1135_v59 = vpop.eup %1134  ;;  %v774_v61 = vadd.f32 1.0, %v1133_v58 }
 0x1ca   : > { %v776_v63 = vmul.f32 %v1135_v59, %v773_v55  ;;  %vm781_vm3 = vweird.f32 %v1135_v59 }
 0x1cb   : > { %1136 = vrcp.f32 %v774_v61  ;;  %vm782_vm5 = vmor %vm780_vm4, %vm781_vm3  ;;  %v801_v18 = vand.u32 2147483648, %v774_v61  ;;  %v799_v21 = vand.u32 2147483647, %v774_v61  ;;  %vm795_vm8 = vweird.f32 %v774_v61 }
 0x1cc   : > { %v777_v0 = vsub.f32 1.0, %v776_v63 }
 0x1cd   : > { %v802_v49 = vor.u32 1.1754944e-38, %v801_v18  ;;  %vm800_vm10 = vcmp.eq.f32.partialorder %v799_v21, 8.507059e+37 }
 0x1ce   : > { %v778_v6 = vmul.f32 %v1135_v59, %v777_v0 }
 0x1d0   : > { %v779_v8 = vadd.f32 %v1135_v59, %v778_v6 }
 0x1d1   : > { %v1137_v9 = vpop.eup %1136 }
 0x1d2   : > { %v783_v12 = vsel %vm782_vm5, %v1135_v59, %v779_v8  ;;  %v791_v13 = vmul.f32 %v1137_v9, %v774_v61  ;;  %vm796_vm7 = vweird.f32 %v1137_v9 }
 0x1d3   : > { %v788_v15 = vsel %vm785_vm6, %v787_v11, %v783_v12  ;;  %vm797_vm9 = vmor %vm795_vm8, %vm796_vm7 }
 0x1d4   : > { %v805_v16 = vmul.f32 %v788_v15, %v765_v40  ;;  %v792_v17 = vsub.f32 1.0, %v791_v13 }
 0x1d6   : > { %809 = vst [vmem:[#allocation4 + $0x1] sm:$0xff] %v805_v16  ;;  %v793_v20 = vmul.f32 %v1137_v9, %v792_v17  ;;  %864 = vmatmul.f32.vlgmr.msra.gmra.mxu3 %v805_v16 }
 0x1d8   : > { %v794_v22 = vadd.f32 %v1137_v9, %v793_v20 }
 0x1da   : > { %v798_v24 = vsel %vm797_vm9, %v1137_v9, %v794_v22 }
 0x1db   : > { %v803_v25 = vsel %vm800_vm10, %v802_v49, %v798_v24 }
 0x1dc   : > { %v806_v26 = vmul.f32 %v803_v25, %v766_v23 }
 0x1dd   : > { %v811_v27 = vld [vmem:[#allocation4] sm:$0xff] }
 0x1de   : > { %810 = vst [vmem:[#allocation4 + $0x9] sm:$0xff] %v806_v26  ;;  %887 = vmatmul.f32.vlgmr.msrb.gmra.mxu0 %v811_v27  ;;  %867 = vmatmul.f32.gmra.mxu3 %v806_v26 }
 0x1e5   : > { %v812_v28 = vld [vmem:[#allocation4 + $0x8] sm:$0xff] }
 0x1e6   : > { %v894_v29 = vld [vmem:[#allocation4 + $0x2] sm:$0xff]  ;;  %890 = vmatmul.f32.gmra.mxu0 %v812_v28  ;;  %v895_v30 = vld [vmem:[#allocation4 + $0xa] sm:$0xff] }
 0x1e7   : > { %929 = vmatmul.f32.vlgmr.msra.gmra.mxu1 %v894_v29 }
 0x1ef   : > { %932 = vmatmul.f32.gmra.mxu1 %v895_v30 }
 0x259   : > { %v865_v32 = vpop.f32.mrf.mxu3 }
 0x25b   : > { %v888_v31 = vpop.f32.mrf.mxu0 }
 0x25c   : > { %v889_v33 = vadd.f32 %v888_v31, %v865_v32 }
 0x261   : > { %v868_v5 = vpop.f32.mrf.mxu3 }
 0x263   : > { %v891_v38 = vpop.f32.mrf.mxu0 }
 0x264   : > { %v930_v35 = vpop.f32.mrf.mxu1  ;;  %v892_v39 = vadd.f32 %v891_v38, %v868_v5 }
 0x265   : > { %v936_v36 = vadd.f32 %v930_v35, %v889_v33 }
 0x267   : > { %v942_v37 = vadd.f32 %v1129_v34, %v936_v36 }
 0x269   : > { %944 = vst.msk [vmem:[%s332_s12] sm:$0xff] %vm375_vm0, %v942_v37 }
 0x26c   : > { %v933_v4 = vpop.f32.mrf.mxu1 }
 0x26d   : > { %v937_v41 = vadd.f32 %v933_v4, %v892_v39 }
 0x26f   : > { %v943_v42 = vadd.f32 %v1129_v34, %v937_v41 }
 0x271   : > { %945 = vst.msk [vmem:[%s332_s12 + $0x8] sm:$0xff] %vm375_vm0, %v943_v42 }
 0x272 PF: > { %s19_s30 = sadd.s32 1, %s1144_s30  }
 0x273   : > { %p16_p4 = scmp.ge.s32.totalorder %s19_s30, 4  }
 0x275   :  { %18 = sbr.rel (!%p16_p4) target bundleno = 1 (0x1), region = 92 }

</bundles_post_ra>
